<compile_context>
chip_gen: v7x
topology: tpu7x:2x2x1
jax: 0.10.0
libtpu: 0.0.40
codegen_flags: <defaults>
</compile_context>

<pallas_src>
import math
from functools import partial

import jax
import jax.numpy as jnp
from jax import lax
from jax.experimental import pallas as pl
from jax.experimental.pallas import tpu as pltpu
import numpy as np


# Conservative scoped-VMEM cap that fits every current chip (v7x has only
# 64 MiB physical VMEM).  On v6e/v5e (128 MiB) this can be raised to 64-96 MiB
# together with larger tq/tk/tm/tn tiles.
_VMEM_LIMIT_BYTES = 32 * 1024 * 1024


def _round_up(x, m):
    return (x + m - 1) // m * m


def _pick_tile(n, target):
    """Largest multiple-of-8 divisor of n that is <= target, else full extent.

    TODO(synk): production shapes with prime-ish N need a masked remainder
    tile instead of falling back to the full extent."""
    if n <= target:
        return n
    for t in range(target, 7, -1):
        if n % t == 0 and t % 8 == 0:
            return t
    return n


def _compiler_params(dims):
    return pltpu.CompilerParams(dimension_semantics=dims,
                                vmem_limit_bytes=_VMEM_LIMIT_BYTES)


# --------------------------------------------------------------------------
# Generic K-tiled linear (used for the output projection)
# --------------------------------------------------------------------------
def _linear_kernel(x_ref, w_ref, b_ref, o_ref, acc_ref):
    kk = pl.program_id(2)

    @pl.when(kk == 0)
    def _():
        acc_ref[...] = jnp.zeros_like(acc_ref)

    acc_ref[...] += jnp.dot(x_ref[...], w_ref[...],
                            preferred_element_type=jnp.float32)

    @pl.when(kk == pl.num_programs(2) - 1)
    def _():
        o_ref[...] = (acc_ref[...] + b_ref[...]).astype(o_ref.dtype)


def linear_pallas(x2d, w, b, *, tm=256, tn=512, tk=512):
    """x2d: (M, K), w: (K, N) (= torch W^T), b: (N,) -> (M, N).

    cdiv/pad remainder handling (never one giant block), K tiled with an f32
    accumulator, weight block constant across the grid when it fits one block."""
    M, K = x2d.shape
    N = w.shape[1]

    tm_ = min(tm, _round_up(M, 8))
    Mp = _round_up(M, tm_)
    tn_, Np = (tn, _round_up(N, tn)) if N > tn else (N, N)
    tk_, Kp = (tk, _round_up(K, tk)) if K > tk else (K, K)

    xp = jnp.pad(x2d, ((0, Mp - M), (0, Kp - K))) if (Mp != M or Kp != K) else x2d
    wp = jnp.pad(w, ((0, Kp - K), (0, Np - N))) if (Kp != K or Np != N) else w
    bp = jnp.pad(b, (0, Np - N)) if Np != N else b

    grid = (Mp // tm_, Np // tn_, Kp // tk_)
    out = pl.pallas_call(
        _linear_kernel,
        out_shape=jax.ShapeDtypeStruct((Mp, Np), x2d.dtype),
        grid=grid,
        in_specs=[
            pl.BlockSpec((tm_, tk_), lambda i, j, kk: (i, kk)),
            pl.BlockSpec((tk_, tn_), lambda i, j, kk: (kk, j)),
            pl.BlockSpec((1, tn_), lambda i, j, kk: (0, j)),
        ],
        out_specs=pl.BlockSpec((tm_, tn_), lambda i, j, kk: (i, j)),
        scratch_shapes=[pltpu.VMEM((tm_, tn_), jnp.float32)],
        compiler_params=_compiler_params(("parallel", "parallel", "arbitrary")),
    )(xp, wp, bp.reshape(1, Np))
    return out[:M, :N] if (Mp != M or Np != N) else out


# --------------------------------------------------------------------------
# Fused qkv projection: one x read, three lane-dense (M, C) outputs
# --------------------------------------------------------------------------
def _qkv_kernel(x_ref, wq_ref, wk_ref, wv_ref, bq_ref, bk_ref, bv_ref,
                q_ref, k_ref, v_ref):
    x = x_ref[...]
    q_ref[...] = (jnp.dot(x, wq_ref[...], preferred_element_type=jnp.float32)
                  + bq_ref[...]).astype(q_ref.dtype)
    k_ref[...] = (jnp.dot(x, wk_ref[...], preferred_element_type=jnp.float32)
                  + bk_ref[...]).astype(k_ref.dtype)
    v_ref[...] = (jnp.dot(x, wv_ref[...], preferred_element_type=jnp.float32)
                  + bv_ref[...]).astype(v_ref.dtype)


def qkv_linear_pallas(x2d, wq, wk, wv, bq, bk, bv, *, tm=256):
    """x2d: (M, C); three (C, C) weights; returns q, k, v each (M, C).

    Weights stay resident (constant block index); M is cdiv/padded to the tile."""
    M, K = x2d.shape
    C = wq.shape[1]
    tm_ = min(tm, _round_up(M, 8))
    Mp = _round_up(M, tm_)
    xp = jnp.pad(x2d, ((0, Mp - M), (0, 0))) if Mp != M else x2d

    q, k, v = pl.pallas_call(
        _qkv_kernel,
        out_shape=(jax.ShapeDtypeStruct((Mp, C), x2d.dtype),) * 3,
        grid=(Mp // tm_,),
        in_specs=[
            pl.BlockSpec((tm_, K), lambda i: (i, 0)),
            pl.BlockSpec((K, C), lambda i: (0, 0)),
            pl.BlockSpec((K, C), lambda i: (0, 0)),
            pl.BlockSpec((K, C), lambda i: (0, 0)),
            pl.BlockSpec((1, C), lambda i: (0, 0)),
            pl.BlockSpec((1, C), lambda i: (0, 0)),
            pl.BlockSpec((1, C), lambda i: (0, 0)),
        ],
        out_specs=(pl.BlockSpec((tm_, C), lambda i: (i, 0)),) * 3,
        compiler_params=_compiler_params(("parallel",)),
    )(xp, wq, wk, wv, bq.reshape(1, C), bk.reshape(1, C), bv.reshape(1, C))
    if Mp != M:
        q, k, v = q[:M], k[:M], v[:M]
    return q, k, v


# --------------------------------------------------------------------------
# Fused per-head LayerNorm + flash attention (+ q residual)
# --------------------------------------------------------------------------
def _make_flash_attn_kernel(num_heads, head_dim, residual_pool, eps=1e-5):
    nh, hd = num_heads, head_dim

    def ln_lane_dense(x, avg, g, b):
        # x: (T, C) f32, avg: (C, C) block-diagonal 1/hd, g/b: (1, C).
        # Per-head mean/var via MXU matmuls -> everything stays lane-dense.
        mu = jnp.dot(x, avg, preferred_element_type=jnp.float32)
        xc = x - mu
        var = jnp.dot(xc * xc, avg, preferred_element_type=jnp.float32)
        return xc * lax.rsqrt(var + eps) * g + b

    def kern(ln_ref, avg_ref, q_ref, k_ref, v_ref, o_ref,
             q_sc, m_sc, l_sc, acc_sc):
        ki = pl.program_id(2)
        avg = avg_ref[...]                                   # (C, C)

        @pl.when(ki == 0)
        def _():
            # LayerNorm of the q tile, computed once per (b, q-tile) and
            # cached for reuse across key tiles and for the residual term.
            q2 = q_ref[0].astype(jnp.float32)                # (TQ, C)
            q_sc[...] = ln_lane_dense(q2, avg, ln_ref[0:1, :], ln_ref[1:2, :])
            m_sc[...] = jnp.full_like(m_sc, -jnp.inf)
            l_sc[...] = jnp.zeros_like(l_sc)
            acc_sc[...] = jnp.zeros_like(acc_sc)

        # LayerNorm of the current k/v tile (k's affine carries 1/sqrt(hd)).
        kn = ln_lane_dense(k_ref[0].astype(jnp.float32), avg,
                           ln_ref[2:3, :], ln_ref[3:4, :])   # (TK, C)
        vn = ln_lane_dense(v_ref[0].astype(jnp.float32), avg,
                           ln_ref[4:5, :], ln_ref[5:6, :])   # (TK, C)
        qn = q_sc[...]                                       # (TQ, C)

        # Online softmax, one 2-D MXU matmul pair per head (static loop).
        for h in range(nh):
            lo, hi = h * hd, (h + 1) * hd
            q_h = qn[:, lo:hi]                               # (TQ, hd)
            k_h = kn[:, lo:hi]                               # (TK, hd)
            v_h = vn[:, lo:hi]                               # (TK, hd)
            s = lax.dot_general(q_h, k_h, (((1,), (1,)), ((), ())),
                                preferred_element_type=jnp.float32)  # (TQ, TK)
            m_prev = m_sc[h]                                 # (TQ, 1)
            m_new = jnp.maximum(m_prev, jnp.max(s, axis=-1, keepdims=True))
            alpha = jnp.exp(m_prev - m_new)
            p = jnp.exp(s - m_new)
            l_sc[h] = alpha * l_sc[h] + jnp.sum(p, axis=-1, keepdims=True)
            acc_sc[h] = alpha * acc_sc[h] + jnp.dot(
                p, v_h, preferred_element_type=jnp.float32)
            m_sc[h] = m_new

        @pl.when(ki == pl.num_programs(2) - 1)
        def _():
            outs = []
            for h in range(nh):
                o_h = acc_sc[h] * pl.reciprocal(l_sc[h], approx=True)
                if residual_pool:
                    o_h = o_h + q_sc[:, h * hd:(h + 1) * hd]
                outs.append(o_h)
            # single lane-dense (TQ, C) store, head-major channel order.
            o_ref[0] = jnp.concatenate(outs, axis=1).astype(o_ref.dtype)

    return kern


def attention_pallas(q, k, v, ln_params, avg_mat, *, num_heads, residual_pool,
                     tq=512, tk=512):
    """q: (B, Nq, C), k/v: (B, Nk, C) head-major; ln_params: (6, C);
    avg_mat: (C, C) block-diagonal per-head averaging matrix -> (B, Nq, C)."""
    B, Nq, C = q.shape
    Nk = k.shape[1]
    hd = C // num_heads
    TQ = _pick_tile(Nq, tq)
    TK = _pick_tile(Nk, tk)
    grid = (B, Nq // TQ, Nk // TK)
    kern = _make_flash_attn_kernel(num_heads, hd, residual_pool)
    return pl.pallas_call(
        kern,
        out_shape=jax.ShapeDtypeStruct((B, Nq, C), q.dtype),
        grid=grid,
        in_specs=[
            pl.BlockSpec((6, C), lambda b, qi, ki: (0, 0)),
            pl.BlockSpec((C, C), lambda b, qi, ki: (0, 0)),
            pl.BlockSpec((1, TQ, C), lambda b, qi, ki: (b, qi, 0)),
            pl.BlockSpec((1, TK, C), lambda b, qi, ki: (b, ki, 0)),
            pl.BlockSpec((1, TK, C), lambda b, qi, ki: (b, ki, 0)),
        ],
        out_specs=pl.BlockSpec((1, TQ, C), lambda b, qi, ki: (b, qi, 0)),
        scratch_shapes=[
            pltpu.VMEM((TQ, C), jnp.float32),                 # LN'd q (cached)
            pltpu.VMEM((num_heads, TQ, 1), jnp.float32),      # running max
            pltpu.VMEM((num_heads, TQ, 1), jnp.float32),      # running sum
            pltpu.VMEM((num_heads, TQ, hd), jnp.float32),     # accumulator
        ],
        compiler_params=_compiler_params(("parallel", "parallel", "arbitrary")),
    )(ln_params, avg_mat, q, k, v)


# --------------------------------------------------------------------------
# Pooling branch (channels-last depthwise Conv3d; LN fused into attention)
# --------------------------------------------------------------------------
# TODO(synk): the depthwise Conv3d (groups=head_dim) is not expressed in Pallas
# (no clean rectangular BlockSpec); it runs channels-last with
# lax.conv_general_dilated so there is no transpose sandwich around it.
def pool_branch(x, thw, conv_w_full, stride, padding):
    """x: (B, N, C) head-major, token 0 = class token.
    conv_w_full: (kT, kH, kW, 1, C) depthwise DHWIO weight.
    Returns the pooled tensor WITHOUT LayerNorm (LN is fused into attention)."""
    B, N, C = x.shape
    T, H, W = thw
    cls_tok = x[:, :1, :]
    rest = x[:, 1:, :].reshape(B, T, H, W, C)
    y = lax.conv_general_dilated(
        rest, conv_w_full,
        window_strides=stride,
        padding=[(p, p) for p in padding],
        dimension_numbers=("NDHWC", "DHWIO", "NDHWC"),
        feature_group_count=C,
    )
    Tn, Hn, Wn = y.shape[1:4]
    y = y.reshape(B, Tn * Hn * Wn, C)
    y = jnp.concatenate([cls_tok, y], axis=1)
    return y, (Tn, Hn, Wn)


def prepare_params(params, *, num_heads, head_dim):
    """One-time host-side repacking:
       - w_qkv split into head-major (C, C) w_q/w_k/w_v (+ biases),
       - torch OIDHW depthwise conv weights -> DHWIO tiled over heads,
       - LN gamma/beta tiled head-major to (1, C) rows of a (6, C) slab,
         with 1/sqrt(head_dim) folded into k's affine params,
       - (C, C) block-diagonal per-head averaging matrix for lane-dense LN."""
    C = num_heads * head_dim
    scaler = 1.0 / math.sqrt(head_dim)

    def conv_full(w_oidhw):                        # (hd, 1, kT, kH, kW)
        w = jnp.transpose(w_oidhw, (2, 3, 4, 1, 0))          # (kT,kH,kW,1,hd)
        return jnp.tile(w, (1, 1, 1, 1, num_heads))          # (kT,kH,kW,1,C)

    def tile_heads(v):                             # (hd,) -> (C,) head-major
        return jnp.tile(v, (num_heads,))

    ln = jnp.stack([
        tile_heads(params["ln_q_g"]), tile_heads(params["ln_q_b"]),
        tile_heads(params["ln_k_g"]) * scaler, tile_heads(params["ln_k_b"]) * scaler,
        tile_heads(params["ln_v_g"]), tile_heads(params["ln_v_b"]),
    ], axis=0).astype(jnp.float32)                            # (6, C)

    head_id = jnp.arange(C) // head_dim
    avg_mat = jnp.where(head_id[:, None] == head_id[None, :],
                        1.0 / head_dim, 0.0).astype(jnp.float32)   # (C, C)

    w_qkv, b_qkv = params["w_qkv"], params["b_qkv"]
    return {
        "w_q": w_qkv[:, :C], "w_k": w_qkv[:, C:2 * C], "w_v": w_qkv[:, 2 * C:],
        "b_q": b_qkv[:C], "b_k": b_qkv[C:2 * C], "b_v": b_qkv[2 * C:],
        "w_proj": params["w_proj"], "b_proj": params["b_proj"],
        "conv_q": conv_full(params["conv_q"]),
        "conv_k": conv_full(params["conv_k"]),
        "conv_v": conv_full(params["conv_v"]),
        "ln_qkv": ln, "avg_mat": avg_mat,
    }


# --------------------------------------------------------------------------
# MultiscaleAttention forward
# --------------------------------------------------------------------------
def multiscale_attention(x, thw, prepared, *, num_heads, residual_pool,
                         stride_q, stride_kv, padding_q, padding_kv):
    B, N, C = x.shape

    # qkv projection: one fused Pallas call emitting q/k/v head-major slabs.
    q, k, v = qkv_linear_pallas(
        x.reshape(B * N, C),
        prepared["w_q"], prepared["w_k"], prepared["w_v"],
        prepared["b_q"], prepared["b_k"], prepared["b_v"])
    q = q.reshape(B, N, C)
    k = k.reshape(B, N, C)
    v = v.reshape(B, N, C)

    # pooling (k, v, then q — q's pooling updates thw), same order as torch.
    # The per-head LayerNorm is deferred into the attention kernel.
    k, _ = pool_branch(k, thw, prepared["conv_k"], stride_kv, padding_kv)
    v, _ = pool_branch(v, thw, prepared["conv_v"], stride_kv, padding_kv)
    q, thw_out = pool_branch(q, thw, prepared["conv_q"], stride_q, padding_q)

    # fused LN + flash attention (+ q residual).
    o = attention_pallas(q, k, v, prepared["ln_qkv"], prepared["avg_mat"],
                         num_heads=num_heads, residual_pool=residual_pool)
    Nq = o.shape[1]

    # output projection (K-tiled Pallas matmul); layout already head-major.
    out = linear_pallas(o.reshape(B * Nq, C), prepared["w_proj"], prepared["b_proj"])
    return out.reshape(B, Nq, C), thw_out


# --------------------------------------------------------------------------
# Pure-JAX reference (independent, mirrors the torch module literally)
# --------------------------------------------------------------------------
def multiscale_attention_ref(x, thw, params, *, num_heads, residual_pool,
                             stride_q, stride_kv, padding_q, padding_kv):
    B, N, C = x.shape
    hd = C // num_heads
    scaler = 1.0 / math.sqrt(hd)
    qkv = x.reshape(B * N, C) @ params["w_qkv"] + params["b_qkv"]
    qkv = qkv.reshape(B, N, 3, num_heads, hd)
    qkv = jnp.transpose(qkv, (0, 3, 2, 1, 4))
    q, k, v = qkv[:, :, 0], qkv[:, :, 1], qkv[:, :, 2]

    def ref_pool(t, conv_w, g, b_, stride, padding):
        Bb, nh, _, dd = t.shape
        T, H, W = thw
        cls_tok = t[:, :, :1, :]
        rest = t[:, :, 1:, :]
        xr = jnp.transpose(rest, (0, 1, 3, 2)).reshape(Bb * nh, dd, T, H, W)
        y = lax.conv_general_dilated(
            xr, conv_w, window_strides=stride,
            padding=[(p, p) for p in padding],
            dimension_numbers=("NCDHW", "OIDHW", "NCDHW"),
            feature_group_count=dd)
        Tn, Hn, Wn = y.shape[2:]
        y = y.reshape(Bb, nh, dd, Tn * Hn * Wn)
        y = jnp.transpose(y, (0, 1, 3, 2))
        y = jnp.concatenate([cls_tok, y], axis=2)
        mu = jnp.mean(y, axis=-1, keepdims=True)
        var = jnp.mean((y - mu) ** 2, axis=-1, keepdims=True)
        y = (y - mu) / jnp.sqrt(var + 1e-5) * g + b_
        return y, (Tn, Hn, Wn)

    k, _ = ref_pool(k, params["conv_k"], params["ln_k_g"], params["ln_k_b"],
                    stride_kv, padding_kv)
    v, _ = ref_pool(v, params["conv_v"], params["ln_v_g"], params["ln_v_b"],
                    stride_kv, padding_kv)
    q, thw_out = ref_pool(q, params["conv_q"], params["ln_q_g"], params["ln_q_b"],
                          stride_q, padding_q)
    attn = jnp.einsum("bhqd,bhkd->bhqk", scaler * q, k)
    attn = jax.nn.softmax(attn, axis=-1)
    o = jnp.einsum("bhqk,bhkd->bhqd", attn, v)
    if residual_pool:
        o = o + q
    o = jnp.transpose(o, (0, 2, 1, 3)).reshape(B, -1, C)
    out = o @ params["w_proj"] + params["b_proj"]
    return out, thw_out


# --------------------------------------------------------------------------
# Main
# --------------------------------------------------------------------------
if __name__ == "__main__":
    # Module config (small but consistent with MViT usage)
    embed_dim = 32
    num_heads = 4
    head_dim = embed_dim // num_heads      # 8
    residual_pool = True
    kernel_q = (3, 3, 3)
    stride_q = (1, 2, 2)
    kernel_kv = (3, 3, 3)
    stride_kv = (1, 1, 1)                  # Nk != Nq to exercise the flash path
    padding_q = tuple(kq // 2 for kq in kernel_q)
    padding_kv = tuple(kv // 2 for kv in kernel_kv)

    B = 2
    thw = (2, 4, 4)
    N = 1 + thw[0] * thw[1] * thw[2]       # class token + spatial tokens = 33

    key = jax.random.PRNGKey(0)
    ks = jax.random.split(key, 12)

    params = {
        "w_qkv":  jax.random.normal(ks[0], (embed_dim, 3 * embed_dim), jnp.float32) * 0.05,
        "b_qkv":  jax.random.normal(ks[1], (3 * embed_dim,), jnp.float32) * 0.01,
        "w_proj": jax.random.normal(ks[2], (embed_dim, embed_dim), jnp.float32) * 0.05,
        "b_proj": jax.random.normal(ks[3], (embed_dim,), jnp.float32) * 0.01,
        # depthwise Conv3d weights: (head_dim, 1, kT, kH, kW), bias=False
        "conv_q": jax.random.normal(ks[4], (head_dim, 1) + kernel_q, jnp.float32) * 0.1,
        "conv_k": jax.random.normal(ks[5], (head_dim, 1) + kernel_kv, jnp.float32) * 0.1,
        "conv_v": jax.random.normal(ks[6], (head_dim, 1) + kernel_kv, jnp.float32) * 0.1,
        # LayerNorm(head_dim) affine params
        "ln_q_g": 1.0 + 0.1 * jax.random.normal(ks[7], (head_dim,), jnp.float32),
        "ln_q_b": 0.1 * jax.random.normal(ks[8], (head_dim,), jnp.float32),
        "ln_k_g": 1.0 + 0.1 * jax.random.normal(ks[9], (head_dim,), jnp.float32),
        "ln_k_b": 0.1 * jax.random.normal(ks[10], (head_dim,), jnp.float32),
        "ln_v_g": jnp.ones((head_dim,), jnp.float32),
        "ln_v_b": jnp.zeros((head_dim,), jnp.float32),
    }

    x = jax.random.normal(ks[11], (B, N, embed_dim), jnp.float32)

    prepared = prepare_params(params, num_heads=num_heads, head_dim=head_dim)

    fwd = partial(multiscale_attention,
                  num_heads=num_heads, residual_pool=residual_pool,
                  stride_q=stride_q, stride_kv=stride_kv,
                  padding_q=padding_q, padding_kv=padding_kv)

    out, thw_out = fwd(x, thw, prepared)
    out = jax.block_until_ready(out)

    # sanity: compare against independent pure-JAX (torch-literal) reference
    ref_out, ref_thw = multiscale_attention_ref(
        x, thw, params, num_heads=num_heads, residual_pool=residual_pool,
        stride_q=stride_q, stride_kv=stride_kv,
        padding_q=padding_q, padding_kv=padding_kv)
    assert thw_out == ref_thw, (thw_out, ref_thw)
    assert out.shape == (B, 1 + thw_out[0] * thw_out[1] * thw_out[2], embed_dim)
    # tolerance accounts for pl.reciprocal(approx=True) in the softmax and
    # MXU f32 accumulation-order differences vs the XLA reference.
    np.testing.assert_allclose(np.asarray(out), np.asarray(ref_out),
                               rtol=2e-2, atol=2e-2)

    print("KERNEL_OK")
</pallas_src>

<mosaic_0001>
module attributes {stable_mosaic.version = 11 : i64} {
  func.func @_qkv_kernel(%arg0: i32, %arg1: memref<72x32xf32, #tpu.memory_space<vmem>>, %arg2: memref<32x32xf32, #tpu.memory_space<vmem>>, %arg3: memref<32x32xf32, #tpu.memory_space<vmem>>, %arg4: memref<32x32xf32, #tpu.memory_space<vmem>>, %arg5: memref<1x32xf32, #tpu.memory_space<vmem>>, %arg6: memref<1x32xf32, #tpu.memory_space<vmem>>, %arg7: memref<1x32xf32, #tpu.memory_space<vmem>>, %arg8: memref<72x32xf32, #tpu.memory_space<vmem>>, %arg9: memref<72x32xf32, #tpu.memory_space<vmem>>, %arg10: memref<72x32xf32, #tpu.memory_space<vmem>>) attributes {dimension_semantics = [#tpu.dimension_semantics<parallel>], iteration_bounds = array<i64: 1>, scalar_prefetch = 0 : i64, scratch_operands = 0 : i64, tpu.core_type = #tpu.core_type<tc>, window_params = [{transform_indices = @transform_0, window_bounds = array<i64: 72, 32>}, {pipeline_mode = #tpu.pipeline_mode<synchronous>, transform_indices = @transform_1, window_bounds = array<i64: 32, 32>}, {pipeline_mode = #tpu.pipeline_mode<synchronous>, transform_indices = @transform_2, window_bounds = array<i64: 32, 32>}, {pipeline_mode = #tpu.pipeline_mode<synchronous>, transform_indices = @transform_3, window_bounds = array<i64: 32, 32>}, {pipeline_mode = #tpu.pipeline_mode<synchronous>, transform_indices = @transform_4, window_bounds = array<i64: 1, 32>}, {pipeline_mode = #tpu.pipeline_mode<synchronous>, transform_indices = @transform_5, window_bounds = array<i64: 1, 32>}, {pipeline_mode = #tpu.pipeline_mode<synchronous>, transform_indices = @transform_6, window_bounds = array<i64: 1, 32>}, {transform_indices = @transform_7, window_bounds = array<i64: 72, 32>}, {transform_indices = @transform_8, window_bounds = array<i64: 72, 32>}, {transform_indices = @transform_9, window_bounds = array<i64: 72, 32>}]} {
    %c0 = arith.constant 0 : index
    %c0_0 = arith.constant 0 : index
    %0 = vector.load %arg1[%c0, %c0_0] : memref<72x32xf32, #tpu.memory_space<vmem>>, vector<72x32xf32>
    %c0_1 = arith.constant 0 : index
    %c0_2 = arith.constant 0 : index
    %1 = vector.load %arg2[%c0_1, %c0_2] : memref<32x32xf32, #tpu.memory_space<vmem>>, vector<32x32xf32>
    %cst = arith.constant dense<0.000000e+00> : vector<72x32xf32>
    %2 = tpu.matmul %0, %1, %cst {dimension_numbers = #tpu.dot_dimension_numbers<[1], [0], [0], [1], [0, 0, 1, 1], [], []>} : vector<72x32xf32>, vector<32x32xf32>, vector<72x32xf32> -> vector<72x32xf32>
    %c0_3 = arith.constant 0 : index
    %c0_4 = arith.constant 0 : index
    %3 = vector.load %arg5[%c0_3, %c0_4] : memref<1x32xf32, #tpu.memory_space<vmem>>, vector<1x32xf32>
    %4 = vector.broadcast %3 : vector<1x32xf32> to vector<72x32xf32>
    %5 = arith.addf %2, %4 : vector<72x32xf32>
    %c0_5 = arith.constant 0 : index
    %c0_6 = arith.constant 0 : index
    %6 = vector.load %arg8[%c0_5, %c0_6] : memref<72x32xf32, #tpu.memory_space<vmem>>, vector<72x32xf32>
    tpu.vector_store %arg8[%c0_5, %c0_6], %5 {strides = array<i32>} : memref<72x32xf32, #tpu.memory_space<vmem>>, vector<72x32xf32>,
    %c0_7 = arith.constant 0 : index
    %c0_8 = arith.constant 0 : index
    %7 = vector.load %arg3[%c0_7, %c0_8] : memref<32x32xf32, #tpu.memory_space<vmem>>, vector<32x32xf32>
    %cst_9 = arith.constant dense<0.000000e+00> : vector<72x32xf32>
    %8 = tpu.matmul %0, %7, %cst_9 {dimension_numbers = #tpu.dot_dimension_numbers<[1], [0], [0], [1], [0, 0, 1, 1], [], []>} : vector<72x32xf32>, vector<32x32xf32>, vector<72x32xf32> -> vector<72x32xf32>
    %c0_10 = arith.constant 0 : index
    %c0_11 = arith.constant 0 : index
    %9 = vector.load %arg6[%c0_10, %c0_11] : memref<1x32xf32, #tpu.memory_space<vmem>>, vector<1x32xf32>
    %10 = vector.broadcast %9 : vector<1x32xf32> to vector<72x32xf32>
    %11 = arith.addf %8, %10 : vector<72x32xf32>
    %c0_12 = arith.constant 0 : index
    %c0_13 = arith.constant 0 : index
    %12 = vector.load %arg9[%c0_12, %c0_13] : memref<72x32xf32, #tpu.memory_space<vmem>>, vector<72x32xf32>
    tpu.vector_store %arg9[%c0_12, %c0_13], %11 {strides = array<i32>} : memref<72x32xf32, #tpu.memory_space<vmem>>, vector<72x32xf32>,
    %c0_14 = arith.constant 0 : index
    %c0_15 = arith.constant 0 : index
    %13 = vector.load %arg4[%c0_14, %c0_15] : memref<32x32xf32, #tpu.memory_space<vmem>>, vector<32x32xf32>
    %cst_16 = arith.constant dense<0.000000e+00> : vector<72x32xf32>
    %14 = tpu.matmul %0, %13, %cst_16 {dimension_numbers = #tpu.dot_dimension_numbers<[1], [0], [0], [1], [0, 0, 1, 1], [], []>} : vector<72x32xf32>, vector<32x32xf32>, vector<72x32xf32> -> vector<72x32xf32>
    %c0_17 = arith.constant 0 : index
    %c0_18 = arith.constant 0 : index
    %15 = vector.load %arg7[%c0_17, %c0_18] : memref<1x32xf32, #tpu.memory_space<vmem>>, vector<1x32xf32>
    %16 = vector.broadcast %15 : vector<1x32xf32> to vector<72x32xf32>
    %17 = arith.addf %14, %16 : vector<72x32xf32>
    %c0_19 = arith.constant 0 : index
    %c0_20 = arith.constant 0 : index
    %18 = vector.load %arg10[%c0_19, %c0_20] : memref<72x32xf32, #tpu.memory_space<vmem>>, vector<72x32xf32>
    tpu.vector_store %arg10[%c0_19, %c0_20], %17 {strides = array<i32>} : memref<72x32xf32, #tpu.memory_space<vmem>>, vector<72x32xf32>,
    return
  }
  func.func @transform_0(%arg0: i32) -> (i32, i32) {
    %c0_i32 = arith.constant 0 : i32
    %c0_i32_0 = arith.constant 0 : i32
    return %arg0, %c0_i32 : i32, i32
  }
  func.func @transform_1(%arg0: i32) -> (i32, i32) {
    %c0_i32 = arith.constant 0 : i32
    %c0_i32_0 = arith.constant 0 : i32
    %c0_i32_1 = arith.constant 0 : i32
    return %c0_i32, %c0_i32_0 : i32, i32
  }
  func.func @transform_2(%arg0: i32) -> (i32, i32) {
    %c0_i32 = arith.constant 0 : i32
    %c0_i32_0 = arith.constant 0 : i32
    %c0_i32_1 = arith.constant 0 : i32
    return %c0_i32, %c0_i32_0 : i32, i32
  }
  func.func @transform_3(%arg0: i32) -> (i32, i32) {
    %c0_i32 = arith.constant 0 : i32
    %c0_i32_0 = arith.constant 0 : i32
    %c0_i32_1 = arith.constant 0 : i32
    return %c0_i32, %c0_i32_0 : i32, i32
  }
  func.func @transform_4(%arg0: i32) -> (i32, i32) {
    %c0_i32 = arith.constant 0 : i32
    %c0_i32_0 = arith.constant 0 : i32
    %c0_i32_1 = arith.constant 0 : i32
    return %c0_i32, %c0_i32_0 : i32, i32
  }
  func.func @transform_5(%arg0: i32) -> (i32, i32) {
    %c0_i32 = arith.constant 0 : i32
    %c0_i32_0 = arith.constant 0 : i32
    %c0_i32_1 = arith.constant 0 : i32
    return %c0_i32, %c0_i32_0 : i32, i32
  }
  func.func @transform_6(%arg0: i32) -> (i32, i32) {
    %c0_i32 = arith.constant 0 : i32
    %c0_i32_0 = arith.constant 0 : i32
    %c0_i32_1 = arith.constant 0 : i32
    return %c0_i32, %c0_i32_0 : i32, i32
  }
  func.func @transform_7(%arg0: i32) -> (i32, i32) {
    %c0_i32 = arith.constant 0 : i32
    %c0_i32_0 = arith.constant 0 : i32
    return %arg0, %c0_i32 : i32, i32
  }
  func.func @transform_8(%arg0: i32) -> (i32, i32) {
    %c0_i32 = arith.constant 0 : i32
    %c0_i32_0 = arith.constant 0 : i32
    return %arg0, %c0_i32 : i32, i32
  }
  func.func @transform_9(%arg0: i32) -> (i32, i32) {
    %c0_i32 = arith.constant 0 : i32
    %c0_i32_0 = arith.constant 0 : i32
    return %arg0, %c0_i32 : i32, i32
  }
}

</mosaic_0001>

<bundles_post_ra>
// kernel: tpu_custom_call.1
= control target key start
LH: loop header
LB: loop body
LE: loop exit
PB: predicated region body
PF: predicated region fallthrough
CT: control target
= control target key end

     0   :  { %v667_v0 = vmov 0.0|0.0   ;;  %vm668_vm0 = vmmov 0   ;;  %v669_v6 = vmov 0.0   ;;  %vm49_vm1 = vcmask 261120   ;;  %s1008_s1 = inlined_call_operand.vmem [shape: f32[32,32], index: 1, kind: input, shape index: {}]   ;;  %s1009_s3 = inlined_call_operand.vmem [shape: f32[32,32], index: 3, kind: input, shape index: {}]   ;;  %s1010_s2 = inlined_call_operand.vmem [shape: f32[32,32], index: 2, kind: input, shape index: {}]   ;;  %s1011_s0 = inlined_call_operand.vmem [shape: f32[72,32], index: 0, kind: input, shape index: {}]   ;;  %s1012_s4 = inlined_call_operand.vmem [shape: f32[1,32], index: 4, kind: input, shape index: {}]   ;;  %s1013_s7 = inlined_call_operand.vmem [shape: f32[72,32], index: 7, kind: output, shape index: {0}]   ;;  %s1014_s5 = inlined_call_operand.vmem [shape: f32[1,32], index: 5, kind: input, shape index: {}]   ;;  %s1015_s6 = inlined_call_operand.vmem [shape: f32[1,32], index: 6, kind: input, shape index: {}]   ;;  %s1016_s8 = inlined_call_operand.vmem [shape: f32[72,32], index: 8, kind: output, shape index: {1}]   ;;  %s1017_s9 = inlined_call_operand.vmem [shape: f32[72,32], index: 9, kind: output, shape index: {2}]  }
   0x1   :  { %642 = vmatprep.subr.bf16.mxu0 %v667_v0  ;;  %v38_v1 = vld [vmem:[%s1008_s1] sm:$0xff]  ;;  %v39_v2 = vld [vmem:[%s1008_s1 + $0x8] sm:$0xff]  ;;  %660 = vmatprep.subr.bf16.mxu1 %v667_v0  ;;  %v40_v3 = vld [vmem:[%s1008_s1 + $0x10] sm:$0xff] }
   0x2   :  { %v643_v4 = vpack.c.bf16 %v39_v2, %v38_v1  ;;  %v41_v5 = vld [vmem:[%s1008_s1 + $0x18] sm:$0xff]  ;;  %545 = vmatprep.mubr.msk.f32.mxu0 %vm668_vm0, %v669_v6  ;;  %560 = vmatprep.mubr.msk.f32.mxu1 %vm668_vm0, %v669_v6  ;;  %v326_v8 = vld [vmem:[%s1009_s3] sm:$0xff]  ;;  %v327_v9 = vld [vmem:[%s1009_s3 + $0x8] sm:$0xff] }
   0x3   :  { %v646_v7 = vpack.c.bf16 %v41_v5, %v40_v3  ;;  %v196_v10 = vld [vmem:[%s1010_s2] sm:$0xff]  ;;  %v197_v11 = vld [vmem:[%s1010_s2 + $0x8] sm:$0xff]  ;;  %v655_v13 = vpack.c.bf16 %v327_v9, %v326_v8  ;;  %v328_v16 = vld [vmem:[%s1009_s3 + $0x10] sm:$0xff] }
   0x4   :  { %644 = vmatpush3.bf16.msra.mxu0 %v643_v4  ;;  %662 = vmatpush3.bf16.msra.mxu1 %v643_v4  ;;  %v29_v12 = vld [vmem:[%s1011_s0] sm:$0xff]  ;;  %v754_v14 = vld [vmem:[%s1011_s0 + $0x28] sm:$0xff]  ;;  %v649_v15 = vpack.c.bf16 %v197_v11, %v196_v10  ;;  %v329_v17 = vld [vmem:[%s1009_s3 + $0x18] sm:$0xff] }
   0x5   :  { %645 = vmatprep.subr.bf16.mxu0 %v667_v0  ;;  %661 = vmatprep.subr.bf16.mxu1 %v667_v0  ;;  %v198_v18 = vld [vmem:[%s1010_s2 + $0x10] sm:$0xff]  ;;  %v199_v19 = vld [vmem:[%s1010_s2 + $0x18] sm:$0xff]  ;;  %v30_v20 = vld [vmem:[%s1011_s0 + $0x8] sm:$0xff]  ;;  %v658_v22 = vpack.c.bf16 %v329_v17, %v328_v16 }
   0x6   :  { %v35_v21 = vld [vmem:[%s1011_s0 + $0x30] sm:$0xff]  ;;  %v652_v23 = vpack.c.bf16 %v199_v19, %v198_v18  ;;  %v36_v25 = vld [vmem:[%s1011_s0 + $0x38] sm:$0xff]  ;;  %v37_v27 = vld [vmem:[%s1011_s0 + $0x40] sm:$0xff] }
   0x7   :  { %v31_v24 = vld [vmem:[%s1011_s0 + $0x10] sm:$0xff]  ;;  %v32_v26 = vld [vmem:[%s1011_s0 + $0x18] sm:$0xff]  ;;  %v33_v28 = vld [vmem:[%s1011_s0 + $0x20] sm:$0xff] }
   0x8   :  { %647 = vmatpush3.bf16.msra.mxu0 %v646_v7  ;;  %663 = vmatpush3.bf16.msra.mxu1 %v646_v7  ;;  %v468_v29 = vld [vmem:[%s1012_s4] ss:$0 sm:$0xff] }
   0x9   :  { %654 = vmatprep.subr.bf16.mxu0 %v667_v0  ;;  %648 = vmatprep.subr.bf16.mxu1 %v667_v0  ;;  %v899_v54 = vld [vmem:[%s1014_s5] ss:$0 sm:$0xff] }
   0xa   :  { %v913_v61 = vld [vmem:[%s1015_s6] ss:$0 sm:$0xff] }
   0xb   :  { %546 = vmatmul.mubr.msk.f32.vlgmr.msra.gmra.mrb[0].mxu0 %vm49_vm1, %v29_v12  ;;  %561 = vmatmul.mubr.msk.f32.vlgmr.msra.gmra.mrb[0].mxu1 %vm49_vm1, %v754_v14 }
   0xc   :  { %656 = vmatpush3.bf16.msra.mxu0 %v655_v13  ;;  %548 = vmatprep.mubr.msk.f32.mxu0 %vm668_vm0, %v669_v6 }
   0xd   :  { %650 = vmatpush3.bf16.msra.mxu1 %v649_v15  ;;  %563 = vmatprep.mubr.msk.f32.mxu1 %vm668_vm0, %v669_v6 }
   0xe   :  { %657 = vmatprep.subr.bf16.mxu0 %v667_v0  ;;  %651 = vmatprep.subr.bf16.mxu1 %v667_v0 }
   0xf   :  { %549 = vmatmul.mubr.msk.f32.gmra.mrb[2].mxu0 %vm49_vm1, %v30_v20  ;;  %564 = vmatmul.mubr.msk.f32.gmra.mrb[2].mxu1 %vm49_vm1, %v35_v21 }
  0x10   :  { %551 = vmatprep.mubr.msk.f32.mxu0 %vm668_vm0, %v669_v6  ;;  %566 = vmatprep.mubr.msk.f32.mxu1 %vm668_vm0, %v669_v6 }
  0x11   :  { %659 = vmatpush3.bf16.msra.mxu0 %v658_v22  ;;  %653 = vmatpush3.bf16.msra.mxu1 %v652_v23 }
  0x13   :  { %552 = vmatmul.mubr.msk.f32.gmra.mrb[4].mxu0 %vm49_vm1, %v31_v24  ;;  %567 = vmatmul.mubr.msk.f32.gmra.mrb[4].mxu1 %vm49_vm1, %v36_v25 }
  0x14   :  { %554 = vmatprep.mubr.msk.f32.mxu0 %vm668_vm0, %v669_v6  ;;  %569 = vmatprep.mubr.msk.f32.mxu1 %vm668_vm0, %v669_v6 }
  0x17   :  { %555 = vmatmul.mubr.msk.f32.gmra.mrb[6].mxu0 %vm49_vm1, %v32_v26  ;;  %570 = vmatmul.mubr.msk.f32.gmra.mrb[6].mxu1 %vm49_vm1, %v37_v27 }
  0x18   :  { %557 = vmatprep.mubr.msk.f32.mxu0 %vm668_vm0, %v669_v6  ;;  %580 = vmatprep.mubr.msk.f32.mxu1 %vm668_vm0, %v669_v6 }
  0x1b   :  { %558 = vmatmul.mubr.msk.f32.gmra.mrb[8].mxu0 %vm49_vm1, %v33_v28  ;;  %581 = vmatmul.mubr.msk.f32.vlgmr.msra.gmra.mrb[8].mxu1 %vm49_vm1, %v29_v12 }
  0x1c   :  { %615 = vmatprep.mubr.msk.f32.mxu0 %vm668_vm0, %v669_v6  ;;  %583 = vmatprep.mubr.msk.f32.mxu1 %vm668_vm0, %v669_v6 }
  0x1f   :  { %616 = vmatmul.mubr.msk.f32.vlgmr.msra.gmra.mrb[10].mxu0 %vm49_vm1, %v29_v12  ;;  %584 = vmatmul.mubr.msk.f32.gmra.mrb[10].mxu1 %vm49_vm1, %v30_v20 }
  0x20   :  { %618 = vmatprep.mubr.msk.f32.mxu0 %vm668_vm0, %v669_v6  ;;  %586 = vmatprep.mubr.msk.f32.mxu1 %vm668_vm0, %v669_v6 }
  0x23   :  { %619 = vmatmul.mubr.msk.f32.gmra.mrb[12].mxu0 %vm49_vm1, %v30_v20  ;;  %587 = vmatmul.mubr.msk.f32.gmra.mrb[12].mxu1 %vm49_vm1, %v31_v24 }
  0x24   :  { %621 = vmatprep.mubr.msk.f32.mxu0 %vm668_vm0, %v669_v6  ;;  %589 = vmatprep.mubr.msk.f32.mxu1 %vm668_vm0, %v669_v6 }
  0x27   :  { %622 = vmatmul.mubr.msk.f32.gmra.mrb[14].mxu0 %vm49_vm1, %v31_v24  ;;  %590 = vmatmul.mubr.msk.f32.gmra.mrb[14].mxu1 %vm49_vm1, %v32_v26 }
  0x28   :  { %624 = vmatprep.mubr.msk.f32.mxu0 %vm668_vm0, %v669_v6  ;;  %592 = vmatprep.mubr.msk.f32.mxu1 %vm668_vm0, %v669_v6 }
  0x2b   :  { %625 = vmatmul.mubr.msk.f32.gmra.mrb[16].mxu0 %vm49_vm1, %v32_v26  ;;  %593 = vmatmul.mubr.msk.f32.gmra.mrb[16].mxu1 %vm49_vm1, %v33_v28 }
  0x2c   :  { %627 = vmatprep.mubr.msk.f32.mxu0 %vm668_vm0, %v669_v6  ;;  %595 = vmatprep.mubr.msk.f32.mxu1 %vm668_vm0, %v669_v6 }
  0x2f   :  { %628 = vmatmul.mubr.msk.f32.gmra.mrb[18].mxu0 %vm49_vm1, %v33_v28  ;;  %596 = vmatmul.mubr.msk.f32.gmra.mrb[18].mxu1 %vm49_vm1, %v754_v14 }
  0x30   :  { %630 = vmatprep.mubr.msk.f32.mxu0 %vm668_vm0, %v669_v6  ;;  %598 = vmatprep.mubr.msk.f32.mxu1 %vm668_vm0, %v669_v6 }
  0x33   :  { %631 = vmatmul.mubr.msk.f32.gmra.mrb[20].mxu0 %vm49_vm1, %v754_v14  ;;  %599 = vmatmul.mubr.msk.f32.gmra.mrb[20].mxu1 %vm49_vm1, %v35_v21 }
  0x34   :  { %633 = vmatprep.mubr.msk.f32.mxu0 %vm668_vm0, %v669_v6  ;;  %601 = vmatprep.mubr.msk.f32.mxu1 %vm668_vm0, %v669_v6 }
  0x37   :  { %634 = vmatmul.mubr.msk.f32.gmra.mrb[22].mxu0 %vm49_vm1, %v35_v21  ;;  %602 = vmatmul.mubr.msk.f32.gmra.mrb[22].mxu1 %vm49_vm1, %v36_v25 }
  0x38   :  { %636 = vmatprep.mubr.msk.f32.mxu0 %vm668_vm0, %v669_v6  ;;  %604 = vmatprep.mubr.msk.f32.mxu1 %vm668_vm0, %v669_v6 }
  0x3b   :  { %637 = vmatmul.mubr.msk.f32.gmra.mrb[24].mxu0 %vm49_vm1, %v36_v25  ;;  %605 = vmatmul.mubr.msk.f32.gmra.mrb[24].mxu1 %vm49_vm1, %v37_v27 }
  0x3c   :  { %639 = vmatprep.mubr.msk.f32.mxu0 %vm668_vm0, %v669_v6 }
  0x3f   :  { %640 = vmatmul.mubr.msk.f32.gmra.mrb[26].mxu0 %vm49_vm1, %v37_v27 }
  0xde   :  { %v143_v30 = vpop.f32.mrb[0].mxu0  ;;  %v168_v31 = vpop.f32.mrb[0].mxu1 }
  0xdf   :  { %v144_v32 = vadd.f32 %v468_v29, %v143_v30  ;;  %v547_v33 = vpop.f32.mrb[1].mxu0  ;;  %v169_v34 = vadd.f32 %v468_v29, %v168_v31  ;;  %v562_v35 = vpop.f32.mrb[1].mxu1 }
  0xe1   :  { %187 = vst.msk [vmem:[%s1013_s7] sm:$0xff] %vm49_vm1, %v144_v32  ;;  %192 = vst.msk [vmem:[%s1013_s7 + $0x28] sm:$0xff] %vm49_vm1, %v169_v34 }
  0xe2   :  { %v148_v36 = vpop.f32.mrb[2].mxu0  ;;  %v173_v37 = vpop.f32.mrb[2].mxu1 }
  0xe3   :  { %v149_v38 = vadd.f32 %v468_v29, %v148_v36  ;;  %v550_v39 = vpop.f32.mrb[3].mxu0  ;;  %v174_v40 = vadd.f32 %v468_v29, %v173_v37  ;;  %v565_v41 = vpop.f32.mrb[3].mxu1 }
  0xe5   :  { %188 = vst.msk [vmem:[%s1013_s7 + $0x8] sm:$0xff] %vm49_vm1, %v149_v38  ;;  %193 = vst.msk [vmem:[%s1013_s7 + $0x30] sm:$0xff] %vm49_vm1, %v174_v40 }
  0xe6   :  { %v153_v42 = vpop.f32.mrb[4].mxu0  ;;  %v178_v43 = vpop.f32.mrb[4].mxu1 }
  0xe7   :  { %v154_v44 = vadd.f32 %v468_v29, %v153_v42  ;;  %v553_v45 = vpop.f32.mrb[5].mxu0  ;;  %v179_v46 = vadd.f32 %v468_v29, %v178_v43  ;;  %v568_v47 = vpop.f32.mrb[5].mxu1 }
  0xe9   :  { %189 = vst.msk [vmem:[%s1013_s7 + $0x10] sm:$0xff] %vm49_vm1, %v154_v44  ;;  %194 = vst.msk [vmem:[%s1013_s7 + $0x38] sm:$0xff] %vm49_vm1, %v179_v46 }
  0xea   :  { %v158_v48 = vpop.f32.mrb[6].mxu0  ;;  %v183_v49 = vpop.f32.mrb[6].mxu1 }
  0xeb   :  { %v159_v50 = vadd.f32 %v468_v29, %v158_v48  ;;  %v556_v51 = vpop.f32.mrb[7].mxu0  ;;  %v184_v52 = vadd.f32 %v468_v29, %v183_v49  ;;  %v571_v53 = vpop.f32.mrb[7].mxu1 }
  0xed   :  { %190 = vst.msk [vmem:[%s1013_s7 + $0x18] sm:$0xff] %vm49_vm1, %v159_v50  ;;  %195 = vst.msk [vmem:[%s1013_s7 + $0x40] sm:$0xff] %vm49_vm1, %v184_v52 }
  0xee   :  { %v163_v55 = vpop.f32.mrb[8].mxu0  ;;  %v273_v56 = vpop.f32.mrb[8].mxu1 }
  0xef   :  { %v164_v57 = vadd.f32 %v468_v29, %v163_v55  ;;  %v559_v58 = vpop.f32.mrb[9].mxu0  ;;  %v274_v59 = vadd.f32 %v899_v54, %v273_v56  ;;  %v582_v60 = vpop.f32.mrb[9].mxu1 }
  0xf1   :  { %191 = vst.msk [vmem:[%s1013_s7 + $0x20] sm:$0xff] %vm49_vm1, %v164_v57  ;;  %317 = vst.msk [vmem:[%s1016_s8] sm:$0xff] %vm49_vm1, %v274_v59 }
  0xf2   :  { %v403_v62 = vpop.f32.mrb[10].mxu0  ;;  %v278_v63 = vpop.f32.mrb[10].mxu1 }
  0xf3   :  { %v404_v0 = vadd.f32 %v913_v61, %v403_v62  ;;  %v617_v1 = vpop.f32.mrb[11].mxu0  ;;  %v279_v2 = vadd.f32 %v899_v54, %v278_v63  ;;  %v585_v3 = vpop.f32.mrb[11].mxu1 }
  0xf5   :  { %447 = vst.msk [vmem:[%s1017_s9] sm:$0xff] %vm49_vm1, %v404_v0  ;;  %318 = vst.msk [vmem:[%s1016_s8 + $0x8] sm:$0xff] %vm49_vm1, %v279_v2 }
  0xf6   :  { %v408_v4 = vpop.f32.mrb[12].mxu0  ;;  %v283_v5 = vpop.f32.mrb[12].mxu1 }
  0xf7   :  { %v409_v6 = vadd.f32 %v913_v61, %v408_v4  ;;  %v620_v7 = vpop.f32.mrb[13].mxu0  ;;  %v284_v8 = vadd.f32 %v899_v54, %v283_v5  ;;  %v588_v9 = vpop.f32.mrb[13].mxu1 }
  0xf9   :  { %448 = vst.msk [vmem:[%s1017_s9 + $0x8] sm:$0xff] %vm49_vm1, %v409_v6  ;;  %319 = vst.msk [vmem:[%s1016_s8 + $0x10] sm:$0xff] %vm49_vm1, %v284_v8 }
  0xfa   :  { %v413_v10 = vpop.f32.mrb[14].mxu0  ;;  %v288_v11 = vpop.f32.mrb[14].mxu1 }
  0xfb   :  { %v414_v12 = vadd.f32 %v913_v61, %v413_v10  ;;  %v623_v13 = vpop.f32.mrb[15].mxu0  ;;  %v289_v14 = vadd.f32 %v899_v54, %v288_v11  ;;  %v591_v15 = vpop.f32.mrb[15].mxu1 }
  0xfd   :  { %449 = vst.msk [vmem:[%s1017_s9 + $0x10] sm:$0xff] %vm49_vm1, %v414_v12  ;;  %320 = vst.msk [vmem:[%s1016_s8 + $0x18] sm:$0xff] %vm49_vm1, %v289_v14 }
  0xfe   :  { %v418_v16 = vpop.f32.mrb[16].mxu0  ;;  %v293_v17 = vpop.f32.mrb[16].mxu1 }
  0xff   :  { %v419_v18 = vadd.f32 %v913_v61, %v418_v16  ;;  %v626_v19 = vpop.f32.mrb[17].mxu0  ;;  %v294_v20 = vadd.f32 %v899_v54, %v293_v17  ;;  %v594_v21 = vpop.f32.mrb[17].mxu1 }
 0x101   :  { %450 = vst.msk [vmem:[%s1017_s9 + $0x18] sm:$0xff] %vm49_vm1, %v419_v18  ;;  %321 = vst.msk [vmem:[%s1016_s8 + $0x20] sm:$0xff] %vm49_vm1, %v294_v20 }
 0x102   :  { %v423_v22 = vpop.f32.mrb[18].mxu0  ;;  %v298_v23 = vpop.f32.mrb[18].mxu1 }
 0x103   :  { %v424_v24 = vadd.f32 %v913_v61, %v423_v22  ;;  %v629_v25 = vpop.f32.mrb[19].mxu0  ;;  %v299_v26 = vadd.f32 %v899_v54, %v298_v23  ;;  %v597_v27 = vpop.f32.mrb[19].mxu1 }
 0x105   :  { %451 = vst.msk [vmem:[%s1017_s9 + $0x20] sm:$0xff] %vm49_vm1, %v424_v24  ;;  %322 = vst.msk [vmem:[%s1016_s8 + $0x28] sm:$0xff] %vm49_vm1, %v299_v26 }
 0x106   :  { %v428_v28 = vpop.f32.mrb[20].mxu0  ;;  %v303_v29 = vpop.f32.mrb[20].mxu1 }
 0x107   :  { %v429_v30 = vadd.f32 %v913_v61, %v428_v28  ;;  %v632_v31 = vpop.f32.mrb[21].mxu0  ;;  %v304_v32 = vadd.f32 %v899_v54, %v303_v29  ;;  %v600_v33 = vpop.f32.mrb[21].mxu1 }
 0x109   :  { %452 = vst.msk [vmem:[%s1017_s9 + $0x28] sm:$0xff] %vm49_vm1, %v429_v30  ;;  %323 = vst.msk [vmem:[%s1016_s8 + $0x30] sm:$0xff] %vm49_vm1, %v304_v32 }
 0x10a   :  { %v433_v34 = vpop.f32.mrb[22].mxu0  ;;  %v308_v35 = vpop.f32.mrb[22].mxu1 }
 0x10b   :  { %v434_v36 = vadd.f32 %v913_v61, %v433_v34  ;;  %v635_v37 = vpop.f32.mrb[23].mxu0  ;;  %v309_v38 = vadd.f32 %v899_v54, %v308_v35  ;;  %v603_v39 = vpop.f32.mrb[23].mxu1 }
 0x10d   :  { %453 = vst.msk [vmem:[%s1017_s9 + $0x30] sm:$0xff] %vm49_vm1, %v434_v36  ;;  %324 = vst.msk [vmem:[%s1016_s8 + $0x38] sm:$0xff] %vm49_vm1, %v309_v38 }
 0x10e   :  { %v438_v40 = vpop.f32.mrb[24].mxu0  ;;  %v313_v41 = vpop.f32.mrb[24].mxu1 }
 0x10f   :  { %v439_v42 = vadd.f32 %v913_v61, %v438_v40  ;;  %v638_v43 = vpop.f32.mrb[25].mxu0  ;;  %v314_v44 = vadd.f32 %v899_v54, %v313_v41  ;;  %v606_v45 = vpop.f32.mrb[25].mxu1 }
 0x111   :  { %454 = vst.msk [vmem:[%s1017_s9 + $0x38] sm:$0xff] %vm49_vm1, %v439_v42  ;;  %325 = vst.msk [vmem:[%s1016_s8 + $0x40] sm:$0xff] %vm49_vm1, %v314_v44 }
 0x112   :  { %v443_v46 = vpop.f32.mrb[26].mxu0 }
 0x113   :  { %v444_v47 = vadd.f32 %v913_v61, %v443_v46  ;;  %v641_v48 = vpop.f32.mrb[27].mxu0 }
 0x115   :  { %455 = vst.msk [vmem:[%s1017_s9 + $0x40] sm:$0xff] %vm49_vm1, %v444_v47 }

</bundles_post_ra>
